<compile_context>
chip_gen: v7x
topology: tpu7x:2x2x1
jax: 0.10.0
libtpu: 0.0.40
codegen_flags: <defaults>
</compile_context>

<pallas_src>
import functools

import jax
import jax.numpy as jnp
import numpy as np
from jax.experimental import pallas as pl
from jax.experimental.pallas import tpu as pltpu


def _offroad_kernel(pts_ref, edges_ref, out_ref, min_dsq_ref, hits_ref, *,
                    threshold):
    eps = 1e-6
    e_idx = pl.program_id(2)

    # --- init full-width accumulators on the first edge chunk --------------
    @pl.when(e_idx == 0)
    def _():
        min_dsq_ref[...] = jnp.full(min_dsq_ref.shape, jnp.inf, jnp.float32)
        hits_ref[...] = jnp.zeros(hits_ref.shape, jnp.int32)

    pts = pts_ref[...]              # (TP, 2)
    px = pts[:, 0:1]                # (TP, 1)
    py = pts[:, 1:2]                # (TP, 1)

    e = edges_ref[...]              # (4, EC) = [ex0; ey0; ex1; ey1]
    ex0 = e[0:1, :]                 # (1, EC)
    ey0 = e[1:2, :]
    ex1 = e[2:3, :]
    ey1 = e[3:4, :]

    # --- per-edge-only quantities: O(EC), divides stay off the hot path ----
    evx = ex1 - ex0
    evy = ey1 - ey0
    inv_edge_sq = 1.0 / (evx * evx + evy * evy + eps)   # (1, EC)
    slope = evy / (evx + eps)                           # eps placement = module
    inv_slope = 1.0 / (slope + eps)                     # (1, EC)

    # --- per (point, edge) hot path: (TP, EC), elementwise VPU only --------
    v1x = px - ex0                                      # (TP, EC)
    v1y = py - ey0
    dot = v1x * evx + v1y * evy
    proj = jnp.clip(dot * inv_edge_sq, 0.0, 1.0)
    dx = v1x - evx * proj                               # point - closest
    dy = v1y - evy * proj
    dist_sq = jnp.maximum(dx * dx + dy * dy, eps)
    min_dsq_ref[...] = jnp.minimum(min_dsq_ref[...], dist_sq)

    # Ray casting: (ey0<=py) ^ (ey1<=py) ≡ ((ey0<=py)&(py<ey1)) | ((ey1<=py)&(py<ey0))
    cond_y = (ey0 <= py) ^ (ey1 <= py)                  # (TP, EC) bool
    intersect_x = ex0 + (py - ey0) * inv_slope
    hit = (cond_y & (intersect_x > px)).astype(jnp.int32)
    hits_ref[...] = hits_ref[...] + hit

    # --- finalize on the last edge chunk: single cross-lane reduce ---------
    @pl.when(e_idx == pl.num_programs(2) - 1)
    def _():
        min_dist = jnp.sqrt(jnp.min(min_dsq_ref[...], axis=-1, keepdims=True))
        total_hits = jnp.sum(hits_ref[...], axis=-1, keepdims=True)
        inside = (total_hits & 1) == 1
        md = jnp.where(inside, -min_dist, min_dist)
        out_ref[...] = jnp.maximum(md + threshold, 0.0)


def offroad_loss_polygons(points, drivable_multipolygon, threshold=0.5):
    """points: (B, C, T, 2) f32; drivable_multipolygon: (B, K, N, 2) f32.

    Returns (B, C): per-mode sum over time of relu(signed_dist + threshold).
    """
    points = points.astype(jnp.float32)
    polys = drivable_multipolygon.astype(jnp.float32)
    B, C, T, _ = points.shape
    _, K, N, _ = polys.shape
    P = C * T
    E = K * (N - 1)

    LANE, SUB = 128, 8
    MAX_EC, MAX_TP = 512, 512

    # Balanced edge chunking: EC multiple of 128, minimal sentinel padding.
    n_chunks = pl.cdiv(E, MAX_EC)
    EC = LANE * pl.cdiv(E, LANE * n_chunks)
    E_pad = EC * n_chunks

    # Balanced point tiling: TP multiple of 8, minimal point padding.
    n_ptiles = pl.cdiv(P, MAX_TP)
    TP = SUB * pl.cdiv(P, SUB * n_ptiles)
    P_pad = TP * n_ptiles

    # Points -> (B, P_pad, 2); zero-padded rows are sliced off after the call.
    pts = points.reshape(B, P, 2)
    if P_pad > P:
        pts = jnp.concatenate(
            [pts, jnp.zeros((B, P_pad - P, 2), jnp.float32)], axis=1)

    # Edges -> (B, 4, E_pad) = [ex0; ey0; ex1; ey1].  Sentinel pad edges are
    # degenerate (ey0 == ey1 -> no ray hit) and far away (dist^2 ~ 1e18 never
    # wins the min).
    start = polys[:, :, :-1, :].reshape(B, E, 2)
    end = polys[:, :, 1:, :].reshape(B, E, 2)
    edges = jnp.stack(
        [start[..., 0], start[..., 1], end[..., 0], end[..., 1]], axis=1)
    if E_pad > E:
        SENTINEL = 1e9
        edges = jnp.concatenate(
            [edges, jnp.full((B, 4, E_pad - E), SENTINEL, jnp.float32)],
            axis=-1)

    kernel = functools.partial(_offroad_kernel, threshold=float(threshold))

    loss_pt = pl.pallas_call(
        kernel,
        out_shape=jax.ShapeDtypeStruct((B, P_pad, 1), jnp.float32),
        grid=(B, n_ptiles, n_chunks),
        in_specs=[pl.BlockSpec((None, TP, 2), lambda b, p, e: (b, p, 0)),
                  pl.BlockSpec((None, 4, EC), lambda b, p, e: (b, 0, e))],
        out_specs=pl.BlockSpec((None, TP, 1), lambda b, p, e: (b, p, 0)),
        scratch_shapes=[pltpu.VMEM((TP, EC), jnp.float32),   # running dist^2
                        pltpu.VMEM((TP, EC), jnp.int32)],    # running hits
        compiler_params=pltpu.CompilerParams(
            dimension_semantics=("parallel", "parallel", "arbitrary"),
            vmem_limit_bytes=32 * 1024 * 1024),
    )(pts, edges)

    # Drop padded point rows, then per-point loss -> per-mode loss (sum over T).
    return loss_pt[:, :P, 0].reshape(B, C, T).sum(axis=-1)


def offroad_loss_reference(points, polys, threshold=0.5):
    """Pure-JAX replica of the PyTorch forward for validation."""
    eps = 1e-6
    pts = points[:, None, :, :, None, :]        # (B,1,C,T,1,2)
    poly = polys[:, :, None, None, :, :]        # (B,K,1,1,N,2)
    start = poly[..., :-1, :]
    end = poly[..., 1:, :]
    v1 = pts - start
    ev = end - start
    dot = (v1 * ev).sum(-1)
    edge_sq = (ev * ev).sum(-1)
    proj = jnp.clip(dot / (edge_sq + eps), 0.0, 1.0)
    closest = ev * proj[..., None] + start
    dist_sq = jnp.maximum(((pts - closest) ** 2).sum(-1), eps)
    min_dist = jnp.sqrt(dist_sq).min(-1).min(1)                # (B,C,T)
    cond_y = (((start[..., 1] <= pts[..., 1]) & (pts[..., 1] < end[..., 1])) |
              ((end[..., 1] <= pts[..., 1]) & (pts[..., 1] < start[..., 1])))
    slope = (end[..., 1] - start[..., 1]) / (end[..., 0] - start[..., 0] + eps)
    ix = start[..., 0] + (pts[..., 1] - start[..., 1]) / (slope + eps)
    inter = cond_y & (ix > pts[..., 0])
    inside = (inter.sum(-1).sum(1) % 2) == 1
    md = jnp.where(inside, -min_dist, min_dist)
    return jnp.maximum(md + threshold, 0.0).sum(-1)


def _make_inputs(key, B, C, T, K, N):
    k1, k2, k3 = jax.random.split(key, 3)
    points = jax.random.uniform(k1, (B, C, T, 2), minval=-10.0, maxval=10.0,
                                dtype=jnp.float32)
    # Closed rings: center + radius * unit circle samples.
    centers = jax.random.uniform(k2, (B, K, 1, 2), minval=-8.0, maxval=8.0,
                                 dtype=jnp.float32)
    radii = jax.random.uniform(k3, (B, K, 1, 1), minval=2.0, maxval=6.0,
                               dtype=jnp.float32)
    theta = jnp.linspace(0.0, 2.0 * jnp.pi, N)
    ring = jnp.stack([jnp.cos(theta), jnp.sin(theta)], axis=-1)  # (N, 2)
    polygons = (centers + radii * ring[None, None]).astype(jnp.float32)
    # Enforce exact closure (first point == last point), as the module assumes.
    polygons = polygons.at[:, :, -1, :].set(polygons[:, :, 0, :])
    return points, polygons


if __name__ == "__main__":
    key = jax.random.PRNGKey(0)
    ka, kb = jax.random.split(key, 2)

    # Case 1: small shapes, single edge chunk, P multiple of 8
    # (P = 32, E = 48 -> EC = 128, one chunk).
    pts1, poly1 = _make_inputs(ka, B=2, C=4, T=8, K=3, N=17)
    out1 = jax.block_until_ready(offroad_loss_polygons(pts1, poly1, 0.5))
    ref1 = offroad_loss_reference(pts1, poly1, 0.5)
    np.testing.assert_allclose(np.asarray(out1), np.asarray(ref1),
                               rtol=1e-4, atol=1e-4)

    # Case 2: exercises point padding (P = 36 -> TP = 40) and multi-chunk
    # edge streaming with sentinels (E = 645 -> 2 chunks of 384).
    pts2, poly2 = _make_inputs(kb, B=2, C=4, T=9, K=5, N=130)
    out2 = jax.block_until_ready(offroad_loss_polygons(pts2, poly2, 0.5))
    ref2 = offroad_loss_reference(pts2, poly2, 0.5)
    np.testing.assert_allclose(np.asarray(out2), np.asarray(ref2),
                               rtol=1e-4, atol=1e-4)

    print("KERNEL_OK")
</pallas_src>

<mosaic_0001>
module attributes {stable_mosaic.version = 11 : i64} {
  func.func @_offroad_kernel(%arg0: i32, %arg1: i32, %arg2: i32, %arg3: memref<1x32x2xf32, #tpu.memory_space<vmem>>, %arg4: memref<1x4x128xf32, #tpu.memory_space<vmem>>, %arg5: memref<1x32x1xf32, #tpu.memory_space<vmem>>, %arg6: memref<32x128xf32, #tpu.memory_space<vmem>>, %arg7: memref<32x128xi32, #tpu.memory_space<vmem>>) attributes {dimension_semantics = [#tpu.dimension_semantics<parallel>, #tpu.dimension_semantics<parallel>, #tpu.dimension_semantics<arbitrary>], iteration_bounds = array<i64: 2, 1, 1>, scalar_prefetch = 0 : i64, scratch_operands = 2 : i64, tpu.core_type = #tpu.core_type<tc>, window_params = [{transform_indices = @transform_0, window_bounds = array<i64: 1, 32, 2>}, {transform_indices = @transform_1, window_bounds = array<i64: 1, 4, 128>}, {transform_indices = @transform_2, window_bounds = array<i64: 1, 32, 1>}]} {
    %c0_i32 = arith.constant 0 : i32
    %0 = arith.cmpi eq, %arg2, %c0_i32 : i32
    %1 = arith.extui %0 : i1 to i32
    %c0_i32_0 = arith.constant 0 : i32
    %2 = arith.cmpi ne, %1, %c0_i32_0 : i32
    scf.if %2 {
      %cst_23 = arith.constant 0x7F800000 : f32
      %84 = vector.broadcast %cst_23 : f32 to vector<32x128xf32>
      %c0_24 = arith.constant 0 : index
      %c0_25 = arith.constant 0 : index
      %85 = vector.load %arg6[%c0_24, %c0_25] : memref<32x128xf32, #tpu.memory_space<vmem>>, vector<32x128xf32>
      tpu.vector_store %arg6[%c0_24, %c0_25], %84 {strides = array<i32>} : memref<32x128xf32, #tpu.memory_space<vmem>>, vector<32x128xf32>,
      %c0_i32_26 = arith.constant 0 : i32
      %86 = vector.broadcast %c0_i32_26 : i32 to vector<32x128xi32>
      %c0_27 = arith.constant 0 : index
      %c0_28 = arith.constant 0 : index
      %87 = vector.load %arg7[%c0_27, %c0_28] : memref<32x128xi32, #tpu.memory_space<vmem>>, vector<32x128xi32>
      tpu.vector_store %arg7[%c0_27, %c0_28], %86 {strides = array<i32>} : memref<32x128xi32, #tpu.memory_space<vmem>>, vector<32x128xi32>,
    } else {
    }
    %c0 = arith.constant 0 : index
    %c0_1 = arith.constant 0 : index
    %c0_2 = arith.constant 0 : index
    %3 = vector.load %arg3[%c0, %c0_1, %c0_2] : memref<1x32x2xf32, #tpu.memory_space<vmem>>, vector<1x32x2xf32>
    %4 = vector.shape_cast %3 : vector<1x32x2xf32> to vector<32x2xf32>
    %5 = vector.extract_strided_slice %4 {offsets = [0, 0], sizes = [32, 1], strides = [1, 1]} : vector<32x2xf32> to vector<32x1xf32>
    %6 = vector.extract_strided_slice %4 {offsets = [0, 1], sizes = [32, 1], strides = [1, 1]} : vector<32x2xf32> to vector<32x1xf32>
    %c0_3 = arith.constant 0 : index
    %c0_4 = arith.constant 0 : index
    %c0_5 = arith.constant 0 : index
    %7 = vector.load %arg4[%c0_3, %c0_4, %c0_5] : memref<1x4x128xf32, #tpu.memory_space<vmem>>, vector<1x4x128xf32>
    %8 = vector.shape_cast %7 : vector<1x4x128xf32> to vector<4x128xf32>
    %9 = vector.extract_strided_slice %8 {offsets = [0, 0], sizes = [1, 128], strides = [1, 1]} : vector<4x128xf32> to vector<1x128xf32>
    %10 = vector.extract_strided_slice %8 {offsets = [1, 0], sizes = [1, 128], strides = [1, 1]} : vector<4x128xf32> to vector<1x128xf32>
    %11 = vector.extract_strided_slice %8 {offsets = [2, 0], sizes = [1, 128], strides = [1, 1]} : vector<4x128xf32> to vector<1x128xf32>
    %12 = vector.extract_strided_slice %8 {offsets = [3, 0], sizes = [1, 128], strides = [1, 1]} : vector<4x128xf32> to vector<1x128xf32>
    %13 = arith.subf %11, %9 : vector<1x128xf32>
    %14 = arith.subf %12, %10 : vector<1x128xf32>
    %15 = arith.mulf %13, %13 : vector<1x128xf32>
    %16 = arith.mulf %14, %14 : vector<1x128xf32>
    %17 = arith.addf %15, %16 : vector<1x128xf32>
    %cst = arith.constant 9.99999997E-7 : f32
    %18 = vector.broadcast %cst : f32 to vector<1x128xf32>
    %19 = arith.addf %17, %18 : vector<1x128xf32>
    %cst_6 = arith.constant 1.000000e+00 : f32
    %20 = vector.broadcast %cst_6 : f32 to vector<1x128xf32>
    %21 = arith.divf %20, %19 : vector<1x128xf32>
    %cst_7 = arith.constant 9.99999997E-7 : f32
    %22 = vector.broadcast %cst_7 : f32 to vector<1x128xf32>
    %23 = arith.addf %13, %22 : vector<1x128xf32>
    %24 = arith.divf %14, %23 : vector<1x128xf32>
    %cst_8 = arith.constant 9.99999997E-7 : f32
    %25 = vector.broadcast %cst_8 : f32 to vector<1x128xf32>
    %26 = arith.addf %24, %25 : vector<1x128xf32>
    %cst_9 = arith.constant 1.000000e+00 : f32
    %27 = vector.broadcast %cst_9 : f32 to vector<1x128xf32>
    %28 = arith.divf %27, %26 : vector<1x128xf32>
    %29 = vector.broadcast %5 : vector<32x1xf32> to vector<32x128xf32>
    %30 = vector.broadcast %9 : vector<1x128xf32> to vector<32x128xf32>
    %31 = arith.subf %29, %30 : vector<32x128xf32>
    %32 = vector.broadcast %6 : vector<32x1xf32> to vector<32x128xf32>
    %33 = vector.broadcast %10 : vector<1x128xf32> to vector<32x128xf32>
    %34 = arith.subf %32, %33 : vector<32x128xf32>
    %35 = vector.broadcast %13 : vector<1x128xf32> to vector<32x128xf32>
    %36 = arith.mulf %31, %35 : vector<32x128xf32>
    %37 = vector.broadcast %14 : vector<1x128xf32> to vector<32x128xf32>
    %38 = arith.mulf %34, %37 : vector<32x128xf32>
    %39 = arith.addf %36, %38 : vector<32x128xf32>
    %40 = vector.broadcast %21 : vector<1x128xf32> to vector<32x128xf32>
    %41 = arith.mulf %39, %40 : vector<32x128xf32>
    %cst_10 = arith.constant 0.000000e+00 : f32
    %cst_11 = arith.constant 1.000000e+00 : f32
    %42 = vector.broadcast %cst_10 : f32 to vector<32x128xf32>
    %43 = arith.maximumf %42, %41 : vector<32x128xf32>
    %44 = vector.broadcast %cst_11 : f32 to vector<32x128xf32>
    %45 = arith.minimumf %44, %43 : vector<32x128xf32>
    %46 = vector.broadcast %13 : vector<1x128xf32> to vector<32x128xf32>
    %47 = arith.mulf %46, %45 : vector<32x128xf32>
    %48 = arith.subf %31, %47 : vector<32x128xf32>
    %49 = vector.broadcast %14 : vector<1x128xf32> to vector<32x128xf32>
    %50 = arith.mulf %49, %45 : vector<32x128xf32>
    %51 = arith.subf %34, %50 : vector<32x128xf32>
    %52 = arith.mulf %48, %48 : vector<32x128xf32>
    %53 = arith.mulf %51, %51 : vector<32x128xf32>
    %54 = arith.addf %52, %53 : vector<32x128xf32>
    %cst_12 = arith.constant 9.99999997E-7 : f32
    %55 = vector.broadcast %cst_12 : f32 to vector<32x128xf32>
    %56 = arith.maximumf %54, %55 : vector<32x128xf32>
    %c0_13 = arith.constant 0 : index
    %c0_14 = arith.constant 0 : index
    %57 = vector.load %arg6[%c0_13, %c0_14] : memref<32x128xf32, #tpu.memory_space<vmem>>, vector<32x128xf32>
    %58 = arith.minimumf %57, %56 : vector<32x128xf32>
    %c0_15 = arith.constant 0 : index
    %c0_16 = arith.constant 0 : index
    %59 = vector.load %arg6[%c0_15, %c0_16] : memref<32x128xf32, #tpu.memory_space<vmem>>, vector<32x128xf32>
    tpu.vector_store %arg6[%c0_15, %c0_16], %58 {strides = array<i32>} : memref<32x128xf32, #tpu.memory_space<vmem>>, vector<32x128xf32>,
    %60 = vector.broadcast %10 : vector<1x128xf32> to vector<32x128xf32>
    %61 = vector.broadcast %6 : vector<32x1xf32> to vector<32x128xf32>
    %62 = arith.cmpf ole, %60, %61 : vector<32x128xf32>
    %63 = vector.broadcast %12 : vector<1x128xf32> to vector<32x128xf32>
    %64 = vector.broadcast %6 : vector<32x1xf32> to vector<32x128xf32>
    %65 = arith.cmpf ole, %63, %64 : vector<32x128xf32>
    %66 = arith.xori %62, %65 : vector<32x128xi1>
    %67 = vector.broadcast %6 : vector<32x1xf32> to vector<32x128xf32>
    %68 = vector.broadcast %10 : vector<1x128xf32> to vector<32x128xf32>
    %69 = arith.subf %67, %68 : vector<32x128xf32>
    %70 = vector.broadcast %28 : vector<1x128xf32> to vector<32x128xf32>
    %71 = arith.mulf %69, %70 : vector<32x128xf32>
    %72 = vector.broadcast %9 : vector<1x128xf32> to vector<32x128xf32>
    %73 = arith.addf %72, %71 : vector<32x128xf32>
    %74 = vector.broadcast %5 : vector<32x1xf32> to vector<32x128xf32>
    %75 = arith.cmpf ogt, %73, %74 : vector<32x128xf32>
    %76 = arith.andi %66, %75 : vector<32x128xi1>
    %77 = arith.extui %76 : vector<32x128xi1> to vector<32x128xi32>
    %c0_17 = arith.constant 0 : index
    %c0_18 = arith.constant 0 : index
    %78 = vector.load %arg7[%c0_17, %c0_18] : memref<32x128xi32, #tpu.memory_space<vmem>>, vector<32x128xi32>
    %79 = arith.addi %78, %77 : vector<32x128xi32>
    %c0_19 = arith.constant 0 : index
    %c0_20 = arith.constant 0 : index
    %80 = vector.load %arg7[%c0_19, %c0_20] : memref<32x128xi32, #tpu.memory_space<vmem>>, vector<32x128xi32>
    tpu.vector_store %arg7[%c0_19, %c0_20], %79 {strides = array<i32>} : memref<32x128xi32, #tpu.memory_space<vmem>>, vector<32x128xi32>,
    %c0_i32_21 = arith.constant 0 : i32
    %81 = arith.cmpi eq, %arg2, %c0_i32_21 : i32
    %82 = arith.extui %81 : i1 to i32
    %c0_i32_22 = arith.constant 0 : i32
    %83 = arith.cmpi ne, %82, %c0_i32_22 : i32
    scf.if %83 {
      %c0_23 = arith.constant 0 : index
      %c0_24 = arith.constant 0 : index
      %84 = vector.load %arg6[%c0_23, %c0_24] : memref<32x128xf32, #tpu.memory_space<vmem>>, vector<32x128xf32>
      %cst_25 = arith.constant dense<0x7F800000> : vector<32xf32>
      %85 = vector.multi_reduction <minimumf>, %84, %cst_25 [1] : vector<32x128xf32> to vector<32xf32>
      %86 = vector.shape_cast %85 : vector<32xf32> to vector<32x1xf32>
      %87 = math.sqrt %86 : vector<32x1xf32>
      %c0_26 = arith.constant 0 : index
      %c0_27 = arith.constant 0 : index
      %88 = vector.load %arg7[%c0_26, %c0_27] : memref<32x128xi32, #tpu.memory_space<vmem>>, vector<32x128xi32>
      %cst_28 = arith.constant dense<0> : vector<32xi32>
      %89 = vector.multi_reduction <add>, %88, %cst_28 [1] : vector<32x128xi32> to vector<32xi32>
      %90 = vector.shape_cast %89 : vector<32xi32> to vector<32x1xi32>
      %c1_i32 = arith.constant 1 : i32
      %91 = vector.broadcast %c1_i32 : i32 to vector<32x1xi32>
      %92 = arith.andi %90, %91 : vector<32x1xi32>
      %c1_i32_29 = arith.constant 1 : i32
      %93 = vector.broadcast %c1_i32_29 : i32 to vector<32x1xi32>
      %94 = arith.cmpi eq, %92, %93 : vector<32x1xi32>
      %cst_30 = arith.constant 0.000000e+00 : f32
      %95 = vector.broadcast %cst_30 : f32 to vector<32x1xf32>
      %96 = arith.subf %95, %87 : vector<32x1xf32>
      %97 = arith.select %94, %96, %87 : vector<32x1xi1>, vector<32x1xf32>
      %cst_31 = arith.constant 5.000000e-01 : f32
      %98 = vector.broadcast %cst_31 : f32 to vector<32x1xf32>
      %99 = arith.addf %97, %98 : vector<32x1xf32>
      %cst_32 = arith.constant 0.000000e+00 : f32
      %100 = vector.broadcast %cst_32 : f32 to vector<32x1xf32>
      %101 = arith.maximumf %99, %100 : vector<32x1xf32>
      %c0_33 = arith.constant 0 : index
      %c0_34 = arith.constant 0 : index
      %c0_35 = arith.constant 0 : index
      %102 = vector.load %arg5[%c0_33, %c0_34, %c0_35] : memref<1x32x1xf32, #tpu.memory_space<vmem>>, vector<1x32x1xf32>
      %103 = vector.shape_cast %102 : vector<1x32x1xf32> to vector<32x1xf32>
      %104 = vector.shape_cast %101 : vector<32x1xf32> to vector<1x32x1xf32>
      tpu.vector_store %arg5[%c0_33, %c0_34, %c0_35], %104 {strides = array<i32>} : memref<1x32x1xf32, #tpu.memory_space<vmem>>, vector<1x32x1xf32>,
    } else {
    }
    return
  }
  func.func @transform_0(%arg0: i32, %arg1: i32, %arg2: i32) -> (i32, i32, i32) {
    %c0_i32 = arith.constant 0 : i32
    %c0_i32_0 = arith.constant 0 : i32
    return %arg0, %arg1, %c0_i32 : i32, i32, i32
  }
  func.func @transform_1(%arg0: i32, %arg1: i32, %arg2: i32) -> (i32, i32, i32) {
    %c0_i32 = arith.constant 0 : i32
    %c0_i32_0 = arith.constant 0 : i32
    return %arg0, %c0_i32, %arg2 : i32, i32, i32
  }
  func.func @transform_2(%arg0: i32, %arg1: i32, %arg2: i32) -> (i32, i32, i32) {
    %c0_i32 = arith.constant 0 : i32
    %c0_i32_0 = arith.constant 0 : i32
    return %arg0, %arg1, %c0_i32 : i32, i32, i32
  }
}

</mosaic_0001>

<bundles_post_ra>
// kernel: tpu_custom_call.1
= control target key start
LH: loop header
LB: loop body
LE: loop exit
PB: predicated region body
PF: predicated region fallthrough
CT: control target
= control target key end

     0   :  { %s768_s9 = smov 0   ;;  %s770_s10 = smov 0   ;;  %s949_s0 = inlined_call_operand.vmem [shape: f32[2,32,2], index: 0, kind: input, shape index: {}]   ;;  %s950_s1 = inlined_call_operand.vmem [shape: f32[2,4,128], index: 1, kind: input, shape index: {}]   ;;  %s951_s2 = inlined_call_operand.vmem [shape: f32[2,32,1], index: 2, kind: output, shape index: {}]  }
   0x1   :  { %s772_s11 = smov 0  }
   0x2 LB: > { %s31_s12 = sadd.s32 1, %s745_s10  ;;  %p673_p0 = scmp.ge.s32.totalorder %s749_s11, 1  ;;  %s749_s11 = sphi %s772_s11, %s12_s11   ;;  %s745_s10 = sphi %s770_s10, %s953_s10   ;;  %s741_s9 = sphi %s768_s9, %s952_s9  }
   0x3   : > { %p33_p1 = scmp.ge.s32.totalorder %s31_s12, 2  ;;  %p154_p2 = scmp.lt.s32.totalorder %s749_s11, 3 }
   0x5   : > { %s955_s12 = smov (%p33_p1, %s31_s12), 0  ;;  %p155_p3 = pnand %p673_p0, %p154_p2 }
   0x6   : > { %p192_p4 = scmp.lt.s32.totalorder (!%p155_p3), %s741_s9, 1  ;;  %v751_v0 = vmov (!%p155_p3), 0   ;;  %v752_v5 = vmov (!%p155_p3), 1   ;;  %v276_v15 = vlaneseq (!%p155_p3) }
   0x7   : > { %158 = sbr.rel (%p155_p3) target bundleno = 349 (0x15d), region = 28  ;;  %710 = vset.pattern.permute.xlu1 (!%p155_p3), %v751_v0  ;;  %709 = vset.pattern.permute.xlu0 (!%p155_p3), %v751_v0 }
   0x8   : > { %v277_v18 = vshrl.u32 (!%p155_p3), %v276_v15, 7 }
   0xa   : > { %v278_v20 = vsub.s32 (!%p155_p3), 0, %v277_v18  ;;  %v302_v23 = vsub.s32 (!%p155_p3), 1, %v277_v18  ;;  %v310_v25 = vsub.s32 (!%p155_p3), 2, %v277_v18  ;;  %v318_v30 = vsub.s32 (!%p155_p3), 3, %v277_v18 }
   0xe   : > { %s957_s9 = smov (!%p192_p4, %s741_s9), 1 }
   0xf   : > { %s681_s13 = sshll.u32 %s957_s9, 5  ;;  %s676_s17 = sshll.u32 %s957_s9, 2 }
  0x10   : > { %s199_s16 = scalar_lea.vmem %s949_s0, %s681_s13  ;;  %s207_s20 = scalar_lea.vmem %s950_s1, %s676_s17 }
  0x11   : > { %v232_v1 = vld [vmem:[%s199_s16 + $0x10] sm:$0xff]  ;;  %v230_v2 = vld [vmem:[%s199_s16] sm:$0xff]  ;;  %v233_v3 = vld [vmem:[%s199_s16 + $0x18] sm:$0xff]  ;;  %s216_s23 = scalar_lea.vmem %s951_s2, %s681_s13 }
  0x12   : > { %268 = vperm.xlu1 %710, %v232_v1   ;;  %258 = vperm.xlu0 %709, %v230_v2   ;;  %v231_v4 = vld [vmem:[%s199_s16 + $0x8] sm:$0xff]  ;;  %v234_v6 = vld [vmem:[%s207_s20] sm:$0xf] }
  0x13   : > { %v236_v7 = vrot.slane %v234_v6, 6  ;;  %v804_v24 = vrot.slane %v234_v6, %v278_v20  ;;  %v808_v29 = vrot.slane %v234_v6, %v302_v23  ;;  %v825_v40 = vrot.slane %v234_v6, %v318_v30 }
  0x15   : > { %v238_v8 = vsub.f32 %v234_v6, %v236_v7 }
  0x16   : > { %273 = vperm.xlu1 %710, %v233_v3   ;;  %263 = vperm.xlu0 %709, %v231_v4  }
  0x17   : > { %v247_v9 = vadd.f32 1e-06, %v238_v8  ;;  %v239_v12 = vmul.f32 %v238_v8, %v238_v8  ;;  %v810_v31 = vrot.slane %v238_v8, %v310_v25  ;;  %v819_v34 = vrot.slane %v238_v8, %v318_v30 }
  0x19   : > { %v249_v10 = vrot.slane %v247_v9, 7  ;;  %v241_v14 = vrot.slane %v239_v12, 1 }
  0x1a   : > { %712 = vset.pattern.permute.xlu1 %v752_v5  ;;  %711 = vset.pattern.permute.xlu0 %v752_v5 }
  0x1b   : > { %289 = vperm.xlu1 %712, %v231_v4   ;;  %285 = vperm.xlu0 %711, %v230_v2   ;;  %713 = vrcp.f32 %v249_v10  ;;  %v243_v17 = vadd.f32 %v241_v14, %v239_v12 }
  0x1d   : > { %v244_v19 = vadd.f32 1e-06, %v243_v17 }
  0x1f   : > { %293 = vperm.xlu1 %712, %v232_v1   ;;  %297 = vperm.xlu0 %711, %v233_v3  }
  0x25   : > { %v714_v11 = vpop.eup %713 }
  0x26   : > { %v252_v13 = vmul.f32 %v714_v11, %v238_v8 }
  0x28   : > { %v253_v16 = vadd.f32 1e-06, %v252_v13 }
  0x2a   : > { %715 = vrcp.f32 %v253_v16 }
  0x2b   : > { %717 = vrcp.f32 %v244_v19 }
  0x34   : > { %v716_v28 = vpop.eup %715 }
  0x35   : > { %v407_v35 = vrot.slane %v716_v28, %v318_v30  ;;  %v718_v39 = vpop.eup %717 }
  0x36   : > { %v331_v53 = vrot.slane %v718_v39, %v310_v25 }
  0x91   : > { %v800_v21 = vpop.permute.xlu1 %268  ;;  %v802_v22 = vpop.permute.xlu0 %258 }
  0x92   : > { %v814_v32 = vsub.f32 %v802_v22, %v804_v24  ;;  %v823_v36 = vsub.f32 %v800_v21, %v804_v24 }
  0x94   : > { %v312_v43 = vmul.f32 %v810_v31, %v814_v32  ;;  %v314_v50 = vmul.f32 %v810_v31, %v823_v36 }
  0x95   : > { %v806_v26 = vpop.permute.xlu1 %273  ;;  %v264_v27 = vpop.permute.xlu0 %263 }
  0x96   : > { %v817_v33 = vsub.f32 %v264_v27, %v804_v24  ;;  %v837_v44 = vsub.f32 %v806_v26, %v804_v24 }
  0x98   : > { %v313_v45 = vmul.f32 %v810_v31, %v817_v33  ;;  %v315_v57 = vmul.f32 %v810_v31, %v837_v44 }
  0x9a   : > { %v290_v37 = vpop.permute.xlu1 %289  ;;  %v286_v38 = vpop.permute.xlu0 %285 }
  0x9b   : > { %v828_v41 = vsub.f32 %v290_v37, %v808_v29  ;;  %v831_v42 = vsub.f32 %v286_v38, %v808_v29  ;;  %vm389_vm0 = vcmp.le.f32.partialorder %v808_v29, %v290_v37  ;;  %vm397_vm1 = vcmp.le.f32.partialorder %v825_v40, %v290_v37 }
  0x9c   : > { %vm388_vm2 = vcmp.le.f32.partialorder %v808_v29, %v286_v38  ;;  %vm396_vm3 = vcmp.le.f32.partialorder %v825_v40, %v286_v38  ;;  %vm401_vm4 = vmxor %vm389_vm0, %vm397_vm1 }
  0x9d   : > { %v321_v46 = vmul.f32 %v819_v34, %v828_v41  ;;  %v409_v47 = vmul.f32 %v407_v35, %v828_v41  ;;  %v320_v48 = vmul.f32 %v819_v34, %v831_v42  ;;  %v408_v49 = vmul.f32 %v407_v35, %v831_v42  ;;  %vm400_vm6 = vmxor %vm388_vm2, %vm396_vm3 }
  0x9e   : > { %v850_v51 = vpop.permute.xlu1 %293  ;;  %v852_v52 = vpop.permute.xlu0 %297 }
  0x9f   : > { %v325_v54 = vadd.f32 %v321_v46, %v313_v45  ;;  %v324_v55 = vadd.f32 %v320_v48, %v312_v43  ;;  %v306_v56 = vsub.f32 %v850_v51, %v808_v29  ;;  %v863_v58 = vsub.f32 %v852_v52, %v808_v29 }
  0xa0   : > { %v413_v61 = vadd.f32 %v409_v47, %v804_v24  ;;  %v412_v62 = vadd.f32 %v408_v49, %v804_v24  ;;  %vm390_vm5 = vcmp.le.f32.partialorder %v808_v29, %v850_v51  ;;  %vm398_vm9 = vcmp.le.f32.partialorder %v825_v40, %v850_v51 }
  0xa1   : > { %v322_v59 = vmul.f32 %v819_v34, %v306_v56  ;;  %v410_v60 = vmul.f32 %v407_v35, %v306_v56  ;;  %v323_v63 = vmul.f32 %v819_v34, %v863_v58  ;;  %v333_v1 = vmul.f32 %v331_v53, %v325_v54  ;;  %vm402_vm15 = vmxor %vm390_vm5, %vm398_vm9 }
  0xa2   : > { %v332_v2 = vmul.f32 %v331_v53, %v324_v55  ;;  %v411_v4 = vmul.f32 %v407_v35, %v863_v58  ;;  %vm417_vm7 = vcmp.gt.f32.partialorder %v413_v61, %v264_v27  ;;  %vm416_vm8 = vcmp.gt.f32.partialorder %v412_v62, %v802_v22 }
  0xa3   : > { %v326_v3 = vadd.f32 %v322_v59, %v314_v50  ;;  %v327_v5 = vadd.f32 %v323_v63, %v315_v57  ;;  %vm421_vm10 = vmand %vm401_vm4, %vm417_vm7  ;;  %v337_v6 = vmax.f32 %v333_v1, 0.0  ;;  %vm391_vm11 = vcmp.le.f32.partialorder %v808_v29, %v852_v52 }
  0xa4   : > { %v336_v7 = vmax.f32 %v332_v2, 0.0  ;;  %v881_v8 = vsel %vm421_vm10, 1, %v751_v0  ;;  %vm420_vm12 = vmand %vm400_vm6, %vm416_vm8  ;;  %v414_v10 = vadd.f32 %v410_v60, %v804_v24  ;;  %v415_v18 = vadd.f32 %v411_v4, %v804_v24 }
  0xa5   : > { %v334_v9 = vmul.f32 %v331_v53, %v326_v3  ;;  %v500_v11 = vshrl.u32 %v881_v8, 16  ;;  %v886_v12 = vsel %vm420_vm12, 1, %v751_v0  ;;  %v341_v13 = vmin.f32 %v337_v6, 1.0 }
  0xa6   : > { %v340_v14 = vmin.f32 %v336_v7, 1.0  ;;  %v488_v15 = vshrl.u32 %v886_v12, 16  ;;  %v335_v17 = vmul.f32 %v331_v53, %v327_v5  ;;  %vm418_vm13 = vcmp.gt.f32.partialorder %v414_v10, %v800_v21 }
  0xa7   : > { %v338_v16 = vmax.f32 %v334_v9, 0.0  ;;  %v502_v19 = vcvt.s32.f32 %v500_v11  ;;  %v345_v20 = vmul.f32 %v341_v13, %v810_v31  ;;  %v353_v22 = vmul.f32 %v341_v13, %v819_v34  ;;  %vm422_vm0 = vmand %vm402_vm15, %vm418_vm13 }
  0xa8   : > { %v344_v23 = vmul.f32 %v340_v14, %v810_v31  ;;  %v490_v25 = vcvt.s32.f32 %v488_v15  ;;  %v352_v27 = vmul.f32 %v340_v14, %v819_v34  ;;  %v339_v30 = vmax.f32 %v335_v17, 0.0 }
  0xa9   : > { %v342_v28 = vmin.f32 %v338_v16, 1.0  ;;  %505 = vadd.xlane.f32.xlu1 %v502_v19  ;;  %v349_v35 = vsub.f32 %v817_v33, %v345_v20  ;;  %v357_v37 = vsub.f32 %v828_v41, %v353_v22  ;;  %vm399_vm14 = vcmp.le.f32.partialorder %v825_v40, %v852_v52 }
  0xaa   : > { %v348_v38 = vsub.f32 %v814_v32, %v344_v23  ;;  %493 = vadd.xlane.f32.xlu0 %v490_v25  ;;  %v356_v24 = vsub.f32 %v831_v42, %v352_v27  ;;  %v343_v45 = vmin.f32 %v339_v30, 1.0  ;;  %vm419_vm1 = vcmp.gt.f32.partialorder %v415_v18, %v806_v26  ;;  %vm403_vm2 = vmxor %vm391_vm11, %vm399_vm14 }
  0xab   : > { %v346_v39 = vmul.f32 %v342_v28, %v810_v31  ;;  %v354_v43 = vmul.f32 %v342_v28, %v819_v34  ;;  %v361_v46 = vmul.f32 %v349_v35, %v349_v35  ;;  %v365_v47 = vmul.f32 %v357_v37, %v357_v37  ;;  %vm423_vm3 = vmand %vm403_vm2, %vm419_vm1 }
  0xac   : > { %v360_v33 = vmul.f32 %v348_v38, %v348_v38  ;;  %v364_v32 = vmul.f32 %v356_v24, %v356_v24  ;;  %v347_v48 = vmul.f32 %v343_v45, %v810_v31  ;;  %v355_v50 = vmul.f32 %v343_v45, %v819_v34 }
  0xad   : > { %v350_v41 = vsub.f32 %v823_v36, %v346_v39  ;;  %v358_v42 = vsub.f32 %v306_v56, %v354_v43  ;;  %v369_v49 = vadd.f32 %v365_v47, %v361_v46  ;;  %v426_v21 = vsel %vm422_vm0, 1, %v751_v0 }
  0xae   : > { %v368_v40 = vadd.f32 %v364_v32, %v360_v33  ;;  %v351_v36 = vsub.f32 %v837_v44, %v347_v48  ;;  %v359_v31 = vsub.f32 %v863_v58, %v355_v50  ;;  %v427_v29 = vsel %vm423_vm3, 1, %v751_v0 }
  0xaf   : > { %v362_v51 = vmul.f32 %v350_v41, %v350_v41  ;;  %v366_v53 = vmul.f32 %v358_v42, %v358_v42  ;;  %v373_v54 = vmax.f32 %v369_v49, 1e-06  ;;  %v512_v59 = vshrl.u32 %v426_v21, 16 }
  0xb0   : > { %v372_v55 = vmax.f32 %v368_v40, 1e-06  ;;  %v363_v56 = vmul.f32 %v351_v36, %v351_v36  ;;  %v367_v26 = vmul.f32 %v359_v31, %v359_v31  ;;  %v524_v44 = vshrl.u32 %v427_v29, 16 }
  0xb1   : > { %v370_v34 = vadd.f32 %v366_v53, %v362_v51  ;;  %449 = vmin.xlane.f32.xlu0 %v373_v54  ;;  %v514_v61 = vcvt.s32.f32 %v512_v59  ;;  %v487_v58 = vand.u32 65535, %v886_v12  ;;  %v499_v63 = vand.u32 65535, %v881_v8 }
  0xb2   : > { %447 = vmin.xlane.f32.xlu1 %v372_v55  ;;  %v371_v52 = vadd.f32 %v367_v26, %v363_v56  ;;  %v526_v62 = vcvt.s32.f32 %v524_v44  ;;  %v511_v2 = vand.u32 65535, %v426_v21  ;;  %v523_v4 = vand.u32 65535, %v427_v29 }
  0xb3   : > { %v374_v57 = vmax.f32 %v370_v34, 1e-06  ;;  %v489_v1 = vcvt.s32.f32 %v487_v58  ;;  %v501_v3 = vcvt.s32.f32 %v499_v63  ;;  %vm559_vm14 = vcmask 7168  }
  0xb4   : > { %v375_v60 = vmax.f32 %v371_v52, 1e-06  ;;  %v513_v0 = vcvt.s32.f32 %v511_v2  ;;  %v525_v5 = vcvt.s32.f32 %v523_v4 }
  0xb5   : > { %451 = vmin.xlane.f32.xlu0 %v374_v57 }
  0xb6   : > { %453 = vmin.xlane.f32.xlu1 %v375_v60 }
  0xb9   : > { %517 = vadd.xlane.f32.xlu0 %v514_v61 }
  0xba   : > { %529 = vadd.xlane.f32.xlu1 %v526_v62 }
  0xbd   : > { %491 = vadd.xlane.f32.xlu0 %v489_v1 }
  0xbe   : > { %503 = vadd.xlane.f32.xlu1 %v501_v3 }
  0xc1   : > { %515 = vadd.xlane.f32.xlu0 %v513_v0 }
  0xc2   : > { %527 = vadd.xlane.f32.xlu1 %v525_v5 }
 0x136   : > { %v506_v7 = vpop.xlane.xlu1 %505 }
 0x137   : > { %v494_v6 = vpop.xlane.xlu0 %493  ;;  %v508_v8 = vcvt.f32.s32 %v506_v7 }
 0x138   : > { %v496_v12 = vcvt.f32.s32 %v494_v6 }
 0x139   : > { %v509_v15 = vshll.u32 %v508_v8, 16 }
 0x13a   : > { %v497_v16 = vshll.u32 %v496_v12, 16 }
 0x13e   : > { %v450_v9 = vpop.xlane.xlu0 %449 }
 0x13f   : > { %v448_v10 = vpop.xlane.xlu1 %447  ;;  %719 = vrsqrt.f32 %v450_v9  ;;  %vm464_vm5 = vcmp.eq.f32.partialorder %v450_v9, inf  ;;  %v467_v19 = vand.u32 2147483648, %v450_v9  ;;  %vm466_vm6 = vcmp.eq.f32.partialorder %v450_v9, 0.0 }
 0x140   : > { %721 = vrsqrt.f32 %v448_v10  ;;  %vm457_vm4 = vcmp.eq.f32.partialorder %v448_v10, inf  ;;  %v460_v22 = vand.u32 2147483648, %v448_v10  ;;  %vm459_vm7 = vcmp.eq.f32.partialorder %v448_v10, 0.0 }
 0x142   : > { %v452_v11 = vpop.xlane.xlu0 %451 }
 0x143   : > { %723 = vrsqrt.f32 %v452_v11  ;;  %v454_v13 = vpop.xlane.xlu1 %453  ;;  %vm471_vm8 = vcmp.eq.f32.partialorder %v452_v11, inf  ;;  %vm473_vm9 = vcmp.eq.f32.partialorder %v452_v11, 0.0  ;;  %v474_v24 = vand.u32 2147483648, %v452_v11 }
 0x144   : > { %725 = vrsqrt.f32 %v454_v13  ;;  %vm478_vm10 = vcmp.eq.f32.partialorder %v454_v13, inf  ;;  %vm480_vm11 = vcmp.eq.f32.partialorder %v454_v13, 0.0  ;;  %v481_v41 = vand.u32 2147483648, %v454_v13 }
 0x146   : > { %v518_v14 = vpop.xlane.xlu0 %517 }
 0x147   : > { %v530_v17 = vpop.xlane.xlu1 %529  ;;  %v520_v28 = vcvt.f32.s32 %v518_v14 }
 0x148   : > { %v532_v35 = vcvt.f32.s32 %v530_v17 }
 0x149   : > { %v720_v18 = vpop.eup %719  ;;  %v521_v49 = vshll.u32 %v520_v28, 16 }
 0x14a   : > { %v722_v20 = vpop.eup %721  ;;  %v463_v23 = vmul.f32 %v720_v18, %v450_v9  ;;  %v492_v25 = vpop.xlane.xlu0 %491  ;;  %v533_v36 = vshll.u32 %v532_v35, 16 }
 0x14b   : > { %v456_v27 = vmul.f32 %v722_v20, %v448_v10  ;;  %v495_v30 = vcvt.f32.s32 %v492_v25  ;;  %v504_v37 = vpop.xlane.xlu1 %503 }
 0x14c   : > { %v465_v38 = vsel %vm464_vm5, %v450_v9, %v463_v23  ;;  %v507_v43 = vcvt.f32.s32 %v504_v37 }
 0x14d   : > { %v724_v39 = vpop.eup %723  ;;  %v458_v45 = vsel %vm457_vm4, %v448_v10, %v456_v27  ;;  %v498_v46 = vadd.s32 %v497_v16, %v495_v30  ;;  %v468_v33 = vsel %vm466_vm6, %v467_v19, %v465_v38 }
 0x14e   : > { %v470_v47 = vmul.f32 %v724_v39, %v452_v11  ;;  %v461_v32 = vsel %vm459_vm7, %v460_v22, %v458_v45  ;;  %v516_v42 = vpop.xlane.xlu0 %515  ;;  %v726_v48 = vpop.eup %725  ;;  %v510_v50 = vadd.s32 %v509_v15, %v507_v43  ;;  %v544_v56 = vsub.f32 0.0, %v468_v33 }
 0x14f   : > { %v535_v40 = vand.u32 1, %v498_v46  ;;  %v519_v51 = vcvt.f32.s32 %v516_v42  ;;  %v477_v53 = vmul.f32 %v726_v48, %v454_v13  ;;  %v543_v54 = vsub.f32 0.0, %v461_v32  ;;  %v528_v31 = vpop.xlane.xlu1 %527 }
 0x150   : > { %v472_v55 = vsel %vm471_vm8, %v452_v11, %v470_v47  ;;  %v536_v34 = vand.u32 1, %v510_v50  ;;  %v531_v21 = vcvt.f32.s32 %v528_v31 }
 0x151   : > { %vm539_vm12 = vcmp.eq.s32.totalorder %v535_v40, 1  ;;  %v479_v57 = vsel %vm478_vm10, %v454_v13, %v477_v53  ;;  %v475_v29 = vsel %vm473_vm9, %v474_v24, %v472_v55  ;;  %v522_v52 = vadd.s32 %v521_v49, %v519_v51 }
 0x152   : > { %v547_v26 = vsel %vm539_vm12, %v543_v54, %v461_v32  ;;  %vm540_vm13 = vcmp.eq.s32.totalorder %v536_v34, 1  ;;  %v482_v60 = vsel %vm480_vm11, %v481_v41, %v479_v57  ;;  %v534_v44 = vadd.s32 %v533_v36, %v531_v21 }
 0x153   : > { %v551_v59 = vadd.f32 0.5, %v547_v26  ;;  %v548_v61 = vsel %vm540_vm13, %v544_v56, %v468_v33  ;;  %v537_v58 = vand.u32 1, %v522_v52  ;;  %v545_v2 = vsub.f32 0.0, %v475_v29 }
 0x154   : > { %v552_v62 = vadd.f32 0.5, %v548_v61  ;;  %v538_v1 = vand.u32 1, %v534_v44  ;;  %v546_v3 = vsub.f32 0.0, %v482_v60 }
 0x155   : > { %v555_v63 = vmax.f32 %v551_v59, 0.0  ;;  %vm541_vm15 = vcmp.eq.s32.totalorder %v537_v58, 1 }
 0x156   : > { %v556_v4 = vmax.f32 %v552_v62, 0.0  ;;  %vm542_vm0 = vcmp.eq.s32.totalorder %v538_v1, 1  ;;  %v549_v0 = vsel %vm541_vm15, %v545_v2, %v475_v29 }
 0x157   : > { %560 = vst.msk [vmem:[%s216_s23] sm:$0xff] %vm559_vm14, %v555_v63  ;;  %v550_v5 = vsel %vm542_vm0, %v546_v3, %v482_v60  ;;  %v553_v6 = vadd.f32 0.5, %v549_v0 }
 0x158   : > { %561 = vst.msk [vmem:[%s216_s23 + $0x8] sm:$0xff] %vm559_vm14, %v556_v4  ;;  %v554_v7 = vadd.f32 0.5, %v550_v5 }
 0x159   : > { %v557_v9 = vmax.f32 %v553_v6, 0.0 }
 0x15a   : > { %v558_v10 = vmax.f32 %v554_v7, 0.0 }
 0x15b   : > { %562 = vst.msk [vmem:[%s216_s23 + $0x10] sm:$0xff] %vm559_vm14, %v557_v9 }
 0x15c   : > { %563 = vst.msk [vmem:[%s216_s23 + $0x18] sm:$0xff] %vm559_vm14, %v558_v10 }
 0x15d PF: > { %s12_s11 = sadd.s32 1, %s749_s11   ;;  %s952_s9 = smov %s745_s10 }
 0x15e   : > { %p9_p5 = scmp.ge.s32.totalorder %s12_s11, 4   ;;  %s953_s10 = smov %s955_s12 }
 0x160   :  { %11 = sbr.rel (!%p9_p5) target bundleno = 2 (0x2), region = 69 }

</bundles_post_ra>
